<compile_context>
chip_gen: v7x
topology: tpu7x:2x2x1
jax: 0.10.0
libtpu: 0.0.40
codegen_flags: <defaults>
</compile_context>

<pallas_src>
import functools

import numpy as np
import jax
import jax.numpy as jnp
from jax.experimental import pallas as pl
from jax.experimental.pallas import tpu as pltpu

# Deterministic init values from the PyTorch module.
MANUAL_INIT = (0.1, 0.83, 0.23, 0.42, 0.8, 0.34, 0.53, 0.23, 0.43, 0.35, 0.42,
               0.3, 0.23, 0.45, 0.62, 0.45, 0.53, 0.28, 0.63, 0.24, 0.22, 0.01,
               0.42, 0.62, 0.45, 0.19, 0.08, 0.23, 0.84, 0.11, 0.42, 0.3, 0.23,
               0.01, 0.53, 0.32, 0.53, 0.23, 0.63, 0.24, 0.22, 0.19, 0.08, 0.63,
               0.45, 0.07, 0.84, 0.45, 0.07, 0.28, 0.22, 0.01, 0.08, 0.23, 0.84,
               0.42, 0.62, 0.45, 0.32, 0.11, 0.42, 0.3, 0.42, 0.84, 0.42, 0.19,
               0.11, 0.08, 0.42, 0.24, 0.22, 0.19, 0.23, 0.23, 0.42, 0.01, 0.42,
               0.42, 0.11, 0.28, 0.28, 0.9, 0.34, 0.82, 0.07, 0.32, 0.34, 0.82,
               0.32, 0.32, 0.07, 0.32, 0.34, 0.82, 0.32, 0.32, 0.42, 0.01, 0.84,
               0.45)

# Shapes consistent with len(MANUAL_INIT) == K*C_in*C_out + C_out == 100.
KERNEL_SIZE = 3
IN_CHANNELS = 8
OUT_CHANNELS = 4
PADDING = 1


def _round_up(x, m):
    return (x + m - 1) // m * m


def _convtbc_glu_kernel(x_ref, halo_ref, w_ref, b_ref, out_ref, *,
                        K, B, C_out, tile_n):
    """x_ref: (C_in, tile_n) column tile; halo_ref: (C_in, 128) right halo
    (next 128 columns of the same slab); w_ref: (C_out, K*C_in);
    b_ref: (C_out, 1).  out_ref: (C_out + C_out//2, tile_n) packed output
    (conv rows first, then GLU rows)."""
    C_in = x_ref.shape[0]
    # Tile plus right halo. This is the only materialized copy of the input
    # (1 vreg per 128 lanes for C_in=8) — the (K*C_in, tile_n) im2col buffer
    # of the previous version is gone.
    xw = jnp.concatenate([x_ref[...], halo_ref[...]], axis=-1)

    # K accumulating MXU dots on shifted views of the tile. The k*B-lane
    # misalignment is handled as a lane rotate (XLU slot), not as vst/vld
    # copies; MXU cost is identical to one fused contraction-(K*C_in) push.
    acc = None
    for k in range(K):
        shifted = xw[:, k * B:k * B + tile_n]
        part = jnp.dot(w_ref[:, k * C_in:(k + 1) * C_in], shifted,
                       preferred_element_type=jnp.float32)
        acc = part if acc is None else acc + part

    conv = acc + b_ref[...]                       # bias added once, post-matmul
    half = C_out // 2
    out_ref[:C_out, :] = conv.astype(out_ref.dtype)
    out_ref[C_out:, :] = (conv[:half, :] * jax.nn.sigmoid(conv[half:, :])
                          ).astype(out_ref.dtype)


def conv_glu_forward(x, weight, bias, padding, *, max_tile_n=32768,
                     compute_dtype=None):
    """Returns (glu_out, conv_out) matching ConvGLUTest.forward.

    x: (T, B, C_in); weight: (K, C_in, C_out); bias: (C_out,).
    compute_dtype=jnp.bfloat16 optionally casts the matmul operands (the
    accumulator stays f32); default keeps f32 to match the torch module.
    """
    T, B, C_in = x.shape
    K, C_in_w, C_out = weight.shape
    assert C_in_w == C_in and C_out % 2 == 0
    p = int(padding)
    T_out = T - K + 1 + 2 * p
    assert T_out > 0
    N = T_out * B
    halo = (K - 1) * B
    assert 0 < halo <= 128, "right halo must fit a single 128-lane block"

    # Lane tiling: tile_n is a multiple of 128, <= max_tile_n. Force >= 2 grid
    # steps when N permits so v7x can shard the parallel axis over both TCs.
    n128 = pl.cdiv(N, 128)
    max_chunks = max(max_tile_n // 128, 1)
    num_tiles = pl.cdiv(n128, max_chunks)
    if n128 >= 2:
        num_tiles = max(num_tiles, 2)
    tile_n = 128 * pl.cdiv(n128, num_tiles)
    n_pad = _round_up(N, tile_n)
    grid = (n_pad // tile_n,)
    chunks_per_tile = tile_n // 128

    # (T, B, C) -> lane-dense (C_in, columns) slab. Left pad implements the
    # conv time padding; right pad extends to n_pad + 128 so every tile's halo
    # block is fully in bounds (and zero beyond the valid data).
    # NOTE: this transpose+pad and the output transposes below are wrapper-side
    # XLA copies; if the surrounding model can consume the lane-dense layout
    # directly they should be dropped.
    x2d = jnp.transpose(x, (2, 0, 1)).reshape(C_in, T * B)
    right = n_pad + 128 - (T * B + p * B)
    x2d = jnp.pad(x2d, ((0, 0), (p * B, right)))
    # W2[o, k*C_in + c] = weight[k, c, o]
    w2d = jnp.transpose(weight.reshape(K * C_in, C_out))
    b2d = bias.reshape(C_out, 1).astype(jnp.float32)
    if compute_dtype is not None:
        x2d = x2d.astype(compute_dtype)
        w2d = w2d.astype(compute_dtype)

    half = C_out // 2
    packed = pl.pallas_call(
        functools.partial(_convtbc_glu_kernel, K=K, B=B, C_out=C_out,
                          tile_n=tile_n),
        out_shape=jax.ShapeDtypeStruct((C_out + half, n_pad), x.dtype),
        grid=grid,
        in_specs=[
            # Tile view of the slab.
            pl.BlockSpec((C_in, tile_n), lambda i: (0, i)),
            # 128-lane right-halo view of the SAME slab (x2d passed twice).
            pl.BlockSpec((C_in, 128),
                         lambda i: (0, (i + 1) * chunks_per_tile)),
            pl.BlockSpec((C_out, K * C_in), lambda i: (0, 0)),
            pl.BlockSpec((C_out, 1), lambda i: (0, 0)),
        ],
        out_specs=pl.BlockSpec((C_out + half, tile_n), lambda i: (0, i)),
        compiler_params=pltpu.CompilerParams(
            dimension_semantics=("parallel",),
            vmem_limit_bytes=48 * 1024 * 1024),
    )(x2d, x2d, w2d, b2d)

    # Drop padded columns, split the packed slab, restore TBC layout.
    conv_out = jnp.transpose(packed[:C_out, :N].reshape(C_out, T_out, B),
                             (1, 2, 0))
    glu_out = jnp.transpose(packed[C_out:, :N].reshape(half, T_out, B),
                            (1, 2, 0))
    return glu_out, conv_out


def _reference(x, weight, bias, padding):
    """Plain-JAX reference of conv_tbc + GLU for validation."""
    T, B, C_in = x.shape
    K, _, C_out = weight.shape
    T_out = T - K + 1 + 2 * padding
    x_pad = jnp.pad(x, ((padding, padding), (0, 0), (0, 0)))
    conv = jnp.broadcast_to(bias, (T_out, B, C_out)).astype(jnp.float32)
    for k in range(K):
        conv = conv + jnp.einsum('tbc,co->tbo', x_pad[k:k + T_out], weight[k])
    a, g = conv[..., :C_out // 2], conv[..., C_out // 2:]
    return a * jax.nn.sigmoid(g), conv


if __name__ == "__main__":
    # Deterministic parameters per the module's __init__.
    vals = np.asarray(MANUAL_INIT, dtype=np.float32)
    n_w = KERNEL_SIZE * IN_CHANNELS * OUT_CHANNELS
    weight = jnp.asarray(vals[:n_w].reshape(KERNEL_SIZE, IN_CHANNELS,
                                            OUT_CHANNELS))
    bias = jnp.asarray(vals[n_w:n_w + OUT_CHANNELS])

    # Small deterministic TBC input: (T=16, B=2, C_in=8).
    key = jax.random.PRNGKey(0)
    x = jax.random.normal(key, (16, 2, IN_CHANNELS), dtype=jnp.float32)

    glu_out, conv_out = conv_glu_forward(x, weight, bias, PADDING)
    jax.block_until_ready((glu_out, conv_out))

    ref_glu, ref_conv = _reference(x, weight, bias, PADDING)
    np.testing.assert_allclose(np.asarray(conv_out), np.asarray(ref_conv),
                               rtol=1e-5, atol=1e-5)
    np.testing.assert_allclose(np.asarray(glu_out), np.asarray(ref_glu),
                               rtol=1e-5, atol=1e-5)

    print("KERNEL_OK")
</pallas_src>

<mosaic_0001>
module attributes {stable_mosaic.version = 11 : i64} {
  func.func @_convtbc_glu_kernel(%arg0: i32, %arg1: memref<8x128xf32, #tpu.memory_space<vmem>>, %arg2: memref<8x128xf32, #tpu.memory_space<vmem>>, %arg3: memref<4x24xf32, #tpu.memory_space<vmem>>, %arg4: memref<4x1xf32, #tpu.memory_space<vmem>>, %arg5: memref<6x128xf32, #tpu.memory_space<vmem>>) attributes {dimension_semantics = [#tpu.dimension_semantics<parallel>], iteration_bounds = array<i64: 1>, scalar_prefetch = 0 : i64, scratch_operands = 0 : i64, tpu.core_type = #tpu.core_type<tc>, window_params = [{transform_indices = @transform_0, window_bounds = array<i64: 8, 128>}, {transform_indices = @transform_1, window_bounds = array<i64: 8, 128>}, {pipeline_mode = #tpu.pipeline_mode<synchronous>, transform_indices = @transform_2, window_bounds = array<i64: 4, 24>}, {pipeline_mode = #tpu.pipeline_mode<synchronous>, transform_indices = @transform_3, window_bounds = array<i64: 4, 1>}, {transform_indices = @transform_4, window_bounds = array<i64: 6, 128>}]} {
    %c0 = arith.constant 0 : index
    %c0_0 = arith.constant 0 : index
    %0 = vector.load %arg1[%c0, %c0_0] : memref<8x128xf32, #tpu.memory_space<vmem>>, vector<8x128xf32>
    %c0_1 = arith.constant 0 : index
    %c0_2 = arith.constant 0 : index
    %1 = vector.load %arg2[%c0_1, %c0_2] : memref<8x128xf32, #tpu.memory_space<vmem>>, vector<8x128xf32>
    %2 = tpu.concatenate %0, %1 in 1 : vector<8x128xf32>, vector<8x128xf32> -> vector<8x256xf32>
    %3 = vector.extract_strided_slice %2 {offsets = [0, 0], sizes = [8, 128], strides = [1, 1]} : vector<8x256xf32> to vector<8x128xf32>
    %c0_3 = arith.constant 0 : index
    %c0_4 = arith.constant 0 : index
    %4 = vector.load %arg3[%c0_3, %c0_4] : memref<4x24xf32, #tpu.memory_space<vmem>>, vector<4x8xf32>
    %cst = arith.constant dense<0.000000e+00> : vector<4x128xf32>
    %5 = tpu.matmul %4, %3, %cst {dimension_numbers = #tpu.dot_dimension_numbers<[1], [0], [0], [1], [0, 0, 1, 1], [], []>} : vector<4x8xf32>, vector<8x128xf32>, vector<4x128xf32> -> vector<4x128xf32>
    %6 = vector.extract_strided_slice %2 {offsets = [0, 2], sizes = [8, 128], strides = [1, 1]} : vector<8x256xf32> to vector<8x128xf32>
    %c0_5 = arith.constant 0 : index
    %c8 = arith.constant 8 : index
    %7 = vector.load %arg3[%c0_5, %c8] : memref<4x24xf32, #tpu.memory_space<vmem>>, vector<4x8xf32>
    %cst_6 = arith.constant dense<0.000000e+00> : vector<4x128xf32>
    %8 = tpu.matmul %7, %6, %cst_6 {dimension_numbers = #tpu.dot_dimension_numbers<[1], [0], [0], [1], [0, 0, 1, 1], [], []>} : vector<4x8xf32>, vector<8x128xf32>, vector<4x128xf32> -> vector<4x128xf32>
    %9 = arith.addf %5, %8 : vector<4x128xf32>
    %10 = vector.extract_strided_slice %2 {offsets = [0, 4], sizes = [8, 128], strides = [1, 1]} : vector<8x256xf32> to vector<8x128xf32>
    %c0_7 = arith.constant 0 : index
    %c16 = arith.constant 16 : index
    %11 = vector.load %arg3[%c0_7, %c16] : memref<4x24xf32, #tpu.memory_space<vmem>>, vector<4x8xf32>
    %cst_8 = arith.constant dense<0.000000e+00> : vector<4x128xf32>
    %12 = tpu.matmul %11, %10, %cst_8 {dimension_numbers = #tpu.dot_dimension_numbers<[1], [0], [0], [1], [0, 0, 1, 1], [], []>} : vector<4x8xf32>, vector<8x128xf32>, vector<4x128xf32> -> vector<4x128xf32>
    %13 = arith.addf %9, %12 : vector<4x128xf32>
    %c0_9 = arith.constant 0 : index
    %c0_10 = arith.constant 0 : index
    %14 = vector.load %arg4[%c0_9, %c0_10] : memref<4x1xf32, #tpu.memory_space<vmem>>, vector<4x1xf32>
    %15 = vector.broadcast %14 : vector<4x1xf32> to vector<4x128xf32>
    %16 = arith.addf %13, %15 : vector<4x128xf32>
    %c0_11 = arith.constant 0 : index
    %c0_12 = arith.constant 0 : index
    %17 = vector.load %arg5[%c0_11, %c0_12] : memref<6x128xf32, #tpu.memory_space<vmem>>, vector<4x128xf32>
    tpu.vector_store %arg5[%c0_11, %c0_12], %16 {strides = array<i32>} : memref<6x128xf32, #tpu.memory_space<vmem>>, vector<4x128xf32>,
    %18 = vector.extract_strided_slice %16 {offsets = [0, 0], sizes = [2, 128], strides = [1, 1]} : vector<4x128xf32> to vector<2x128xf32>
    %19 = vector.extract_strided_slice %16 {offsets = [2, 0], sizes = [2, 128], strides = [1, 1]} : vector<4x128xf32> to vector<2x128xf32>
    %20 = arith.negf %19 : vector<2x128xf32>
    %21 = math.exp %20 : vector<2x128xf32>
    %cst_13 = arith.constant 1.000000e+00 : f32
    %22 = vector.broadcast %cst_13 : f32 to vector<2x128xf32>
    %23 = arith.addf %22, %21 : vector<2x128xf32>
    %24 = arith.divf %22, %23 : vector<2x128xf32>
    %25 = arith.mulf %18, %24 : vector<2x128xf32>
    %c4 = arith.constant 4 : index
    %c0_14 = arith.constant 0 : index
    %26 = vector.load %arg5[%c4, %c0_14] : memref<6x128xf32, #tpu.memory_space<vmem>>, vector<2x128xf32>
    tpu.vector_store %arg5[%c4, %c0_14], %25 {strides = array<i32>} : memref<6x128xf32, #tpu.memory_space<vmem>>, vector<2x128xf32>,
    return
  }
  func.func @transform_0(%arg0: i32) -> (i32, i32) {
    %c0_i32 = arith.constant 0 : i32
    %c0_i32_0 = arith.constant 0 : i32
    return %c0_i32, %arg0 : i32, i32
  }
  func.func @transform_1(%arg0: i32) -> (i32, i32) {
    %c1_i32 = arith.constant 1 : i32
    %0 = arith.addi %arg0, %c1_i32 : i32
    %c1_i32_0 = arith.constant 1 : i32
    %1 = arith.muli %0, %c1_i32_0 : i32
    %c0_i32 = arith.constant 0 : i32
    %c0_i32_1 = arith.constant 0 : i32
    return %c0_i32, %1 : i32, i32
  }
  func.func @transform_2(%arg0: i32) -> (i32, i32) {
    %c0_i32 = arith.constant 0 : i32
    %c0_i32_0 = arith.constant 0 : i32
    %c0_i32_1 = arith.constant 0 : i32
    return %c0_i32, %c0_i32_0 : i32, i32
  }
  func.func @transform_3(%arg0: i32) -> (i32, i32) {
    %c0_i32 = arith.constant 0 : i32
    %c0_i32_0 = arith.constant 0 : i32
    %c0_i32_1 = arith.constant 0 : i32
    return %c0_i32, %c0_i32_0 : i32, i32
  }
  func.func @transform_4(%arg0: i32) -> (i32, i32) {
    %c0_i32 = arith.constant 0 : i32
    %c0_i32_0 = arith.constant 0 : i32
    return %c0_i32, %arg0 : i32, i32
  }
}

</mosaic_0001>

<bundles_post_ra>
// kernel: tpu_custom_call.1
= control target key start
LH: loop header
LB: loop body
LE: loop exit
PB: predicated region body
PF: predicated region fallthrough
CT: control target
= control target key end

     0   :  { %9 = vsyncpa [#allocation3], 0  ;;  %s528_s0 = inlined_call_operand.hbm [shape: f32[8,256], index: 0, kind: input, shape index: {}]   ;;  %s529_s1 = inlined_call_operand.hbm [shape: f32[8,256], index: 1, kind: input, shape index: {}]   ;;  %s530_s2 = inlined_call_operand.vmem [shape: f32[4,24], index: 2, kind: input, shape index: {}]   ;;  %s531_s3 = inlined_call_operand.vmem [shape: f32[4,1], index: 3, kind: input, shape index: {}]   ;;  %s532_s4 = inlined_call_operand.hbm [shape: f32[6,128], index: 4, kind: output, shape index: {}]  }
   0x1   :  { %10 = vsyncpa [#allocation6], 0 }
   0x2   :  { %11 = vsyncpa [#allocation4], 0  ;;  %s477_s17 = scalar_lea.hbm %s529_s1, 128  ;;  %s439_s18 = smov [#allocation2]  }
   0x3   :  { %s18_s19 = sshll.u32 %s439_s18, 4  ;;  %s440_s20 = smov [#allocation5]   ;;  %s19_s19 = int_to_ptr.vmem [resolvable:$true] %s18_s19 }
   0x4   :  { %s31_s21 = sshll.u32 %s440_s20, 4  ;;  %s364_s24 = scalar_lea.hbm %s528_s0, 128  ;;  %s32_s21 = int_to_ptr.vmem [resolvable:$true] %s31_s21 }
   0x5   :  { %p365_p0 = scmp.ne.s32.totalorder %s528_s0, %s364_s24  ;;  %s366_s29 = scalar_lea.hbm %s528_s0, 256 }
   0x6   :  { %p367_p1 = scmp.lt.u32.totalorder %s366_s29, %s364_s24  ;;  %p368_p2 = scmp.lt.u32.totalorder %s364_s24, %s528_s0 }
   0x8   :  { %p369_p3 = por %p368_p2, %p367_p1 }
   0xa   :  { %p370_p4 = pnand %p369_p3, %p365_p0 }
   0xc   :  { %373 = shalt.err (!%p370_p4)
}
   0xd   :  { %s374_s6 = scalar_lea.vmem %s19_s19, 128  ;;  %p379_p6 = scmp.lt.s32.totalorder %s19_s19, %s19_s19 }
   0xe   :  { %p375_p5 = scmp.ne.s32.totalorder %s19_s19, %s374_s6  ;;  %p380_p7 = scmp.lt.s32.totalorder %s374_s6, %s374_s6 }
  0x10   :  { %p381_p8 = por %p380_p7, %p379_p6 }
  0x12   :  { %p382_p9 = pnand %p381_p8, %p375_p5 }
  0x14   :  { %385 = shalt.err (!%p382_p9)
}
  0x15   :  { %21 = dma.hbm_to_vmem [thread:$0]  %s528_s0, 128, %s19_s19, [#allocation3]  }
  0x16   :  { %s410_s11 = scalar_lea.hbm %s529_s1, 256  ;;  %p389_p11 = scmp.lt.u32.totalorder %s477_s17, %s529_s1 }
  0x17   :  { %p387_p10 = scmp.ne.s32.totalorder %s477_s17, %s410_s11  ;;  %p390_p12 = scmp.lt.u32.totalorder %s410_s11, %s410_s11 }
  0x18   :  { %p392_p0 = scmp.lt.u32.totalorder %s410_s11, %s477_s17 }
  0x19   :  { %p391_p13 = por %p390_p12, %p389_p11 }
  0x1b   :  { %p393_p1 = por %p392_p0, %p391_p13 }
  0x1d   :  { %p394_p2 = pnand %p393_p1, %p387_p10 }
  0x1f   :  { %397 = shalt.err (!%p394_p2)
}
  0x20   :  { %s398_s14 = scalar_lea.vmem %s32_s21, 128  ;;  %p403_p4 = scmp.lt.s32.totalorder %s32_s21, %s32_s21 }
  0x21   :  { %p399_p3 = scmp.ne.s32.totalorder %s32_s21, %s398_s14  ;;  %p404_p5 = scmp.lt.s32.totalorder %s398_s14, %s398_s14 }
  0x23   :  { %p405_p6 = por %p404_p5, %p403_p4 }
  0x25   :  { %p406_p7 = pnand %p405_p6, %p399_p3 }
  0x27   :  { %409 = shalt.err (!%p406_p7)
}
  0x28   :  { %34 = dma.hbm_to_vmem [thread:$0]  %s477_s17, 128, %s32_s21, [#allocation6]  }
  0x29   :  { %433 = dma.done.wait [#allocation3], 128  }
  0x2a   :  { %434 = vsyncadd [#allocation3], 4294967168 }
  0x2b   :  { %435 = dma.done.wait [#allocation6], 128  }
  0x2c   :  { %436 = vsyncadd [#allocation6], 4294967168  ;;  %v441_v0 = vmov 0.0   ;;  %vm442_vm0 = vmmov 0   ;;  %v443_v1 = vmov 0   ;;  %v46_v2 = vld [vmem:[#allocation2] sm:$0xff] }
  0x2d   :  { %334 = vmatprep.subr.mxu0 %v441_v0  ;;  %339 = vmatprep.subr.mxu1 %v441_v0  ;;  %v48_v3 = vld [vmem:[%s530_s2] sm:$0xf]  ;;  %vm61_vm1 = vcmask 64512   ;;  %s444_s15 = smov 126   ;;  %s445_s16 = smov 120   ;;  %v47_v4 = vld [vmem:[#allocation5] sm:$0xff] }
  0x2e   :  { %336 = vmatprep.mubr.msk.f32.mxu0 %vm442_vm0, %v441_v0  ;;  %341 = vmatprep.mubr.msk.f32.mxu1 %vm442_vm0, %v441_v0  ;;  %s446_s17 = smov 124   ;;  %s447_s18 = smov 112   ;;  %v288_v5 = vld [vmem:[%s531_s3] sm:$0xf]  ;;  %vm58_vm2 = vcmask 1031168   ;;  %vm212_vm3 = vcmask 1014784  }
  0x2f   :  { %359 = vset.pattern.permute.xlu0 %v443_v1  ;;  %50 = vrot.lane.b32.xlu1 %v48_v3, %s445_s16  ;;  %s448_s2 = smov [#allocation7]  }
  0x30   :  { %54 = vrot.lane.b32.xlu0 %v46_v2, %s444_s15  ;;  %340 = vmatpush3.msra.mxu1 %v46_v2  ;;  %s313_s3 = sshll.u32 %s448_s2, 4  ;;  %s314_s3 = int_to_ptr.vmem [resolvable:$true] %s313_s3 }
  0x31   :  { %342 = vmatmul.mubr.msk.f32.vlgmr.msra.gmra.mrb[0].mxu1 %vm61_vm1, %v48_v3  ;;  %s411_s21 = scalar_lea.vmem %s314_s3, 128  ;;  %p416_p9 = scmp.lt.s32.totalorder %s314_s3, %s314_s3 }
  0x32   :  { %p412_p8 = scmp.ne.s32.totalorder %s314_s3, %s411_s21  ;;  %p417_p10 = scmp.lt.s32.totalorder %s411_s21, %s411_s21 }
  0x33   :  { %208 = vrot.lane.b32.xlu1 %v46_v2, %s446_s17 }
  0x34   :  { %56 = vrot.lane.b32.xlu0 %v47_v4, %s444_s15  ;;  %p418_p11 = por %p417_p10, %p416_p9 }
  0x36   :  { %p419_p12 = pnand %p418_p11, %p412_p8 }
  0x37   :  { %206 = vrot.lane.b32.xlu1 %v48_v3, %s447_s18 }
  0x38   :  { %210 = vrot.lane.b32.xlu0 %v47_v4, %s446_s17 }
  0x3c   :  { %291 = vperm.xlu0 %359, %v288_v5  }
  0xa1   :  { %v51_v7 = vpop.permute.xlu1 %50 }
  0xa2   :  { %v55_v6 = vpop.permute.xlu0 %54 }
  0xa5   :  { %v209_v9 = vpop.permute.xlu1 %208 }
  0xa6   :  { %v57_v8 = vpop.permute.xlu0 %56 }
  0xa7   :  { %v59_v10 = vsel %vm58_vm2, %v55_v6, %v57_v8 }
  0xa8   :  { %335 = vmatpush3.msra.mxu0 %v59_v10 }
  0xa9   :  { %337 = vmatmul.mubr.msk.f32.vlgmr.msra.gmra.mrb[0].mxu0 %vm61_vm1, %v51_v7  ;;  %344 = vmatprep.subr.mxu0 %v441_v0  ;;  %v207_v12 = vpop.permute.xlu1 %206 }
  0xaa   :  { %v211_v11 = vpop.permute.xlu0 %210  ;;  %346 = vmatprep.mubr.msk.f32.mxu0 %vm442_vm0, %v441_v0 }
  0xab   :  { %v213_v13 = vsel %vm212_vm3, %v209_v9, %v211_v11 }
  0xac   :  { %345 = vmatpush3.msra.mxu0 %v213_v13 }
  0xad   :  { %347 = vmatmul.mubr.msk.f32.vlgmr.msra.gmra.mrb[2].mxu0 %vm61_vm1, %v207_v12 }
  0xbb   :  { %v292_v20 = vpop.permute.xlu0 %291 }
 0x104   :  { %v202_v14 = vpop.f32.mrb[0].mxu1 }
 0x105   :  { %v343_v15 = vpop.f32.mrb[1].mxu1 }
 0x17c   :  { %v130_v16 = vpop.f32.mrb[0].mxu0 }
 0x17d   :  { %v203_v17 = vadd.f32 %v202_v14, %v130_v16  ;;  %v338_v18 = vpop.f32.mrb[1].mxu0 }
 0x180   :  { %v283_v19 = vpop.f32.mrb[2].mxu0 }
 0x181   :  { %v287_v21 = vadd.f32 %v283_v19, %v203_v17  ;;  %v348_v22 = vpop.f32.mrb[3].mxu0 }
 0x183   :  { %v294_v23 = vadd.f32 %v292_v20, %v287_v21 }
 0x185   :  { %v327_v24 = vmul.f32 -1.442695, %v294_v23  ;;  %295 = vst [vmem:[#allocation7] sm:$0xf] %v294_v23 }
 0x187   :  { %360 = vpow2.f32 %v327_v24 }
 0x191   :  { %v361_v25 = vpop.eup %360 }
 0x192   :  { %v299_v26 = vadd.f32 1.0, %v361_v25 }
 0x194   :  { %362 = vrcp.f32 %v299_v26 }
 0x19e   :  { %v363_v27 = vpop.eup %362 }
 0x19f   :  { %v303_v28 = vrot.slane %v363_v27, 2 }
 0x1a1   :  { %v305_v29 = vmul.f32 %v303_v28, %v294_v23 }
 0x1a3   :  { %306 = vst [vmem:[#allocation7 + $0x4] sm:$0x3] %v305_v29 }
 0x1a4   :  { %422 = shalt.err (!%p419_p12)
}
 0x1a5   :  { %s423_s24 = scalar_lea.hbm %s532_s4, 128 }
 0x1a6   :  { %p424_p13 = scmp.ne.s32.totalorder %s532_s4, %s423_s24  ;;  %p427_p0 = scmp.lt.u32.totalorder %s423_s24, %s532_s4 }
 0x1a8   :  { %p429_p1 = pnand %p427_p0, %p424_p13 }
 0x1aa   :  { %432 = shalt.err (!%p429_p1)
}
 0x1ab   :  { %316 = dma.vmem_to_hbm [thread:$0]  %s314_s3, 128, %s532_s4, [#allocation4]  }
 0x1ac   :  { %437 = dma.done.wait [#allocation4], 128  }
 0x1ad   :  { %438 = vsyncadd [#allocation4], 4294967168 }
 0x1ae   :  { %320 = vsyncpa [#allocation3], 1 }
 0x1af   :  { %321 = vsyncpa [#allocation6], 1 }
 0x1b0   :  { %322 = vsyncpa [#allocation4], 1 }

</bundles_post_ra>
